<compile_context>
chip_gen: v7x
topology: tpu7x:2x2x1
jax: 0.10.0
libtpu: 0.0.40
codegen_flags: <defaults>
</compile_context>

<pallas_src>
import numpy as np
import jax
import jax.numpy as jnp
from jax.experimental import pallas as pl
from jax.experimental.pallas import tpu as pltpu

EPS = 1e-5  # PyTorch BatchNorm3d default eps


def _round_up(x, m):
    return (x + m - 1) // m * m


# --------------------------------------------------------------------------- #
# Pass 1: im2col matmul (MXU, f32 accumulation) + per-tile partial BN stats.
# --------------------------------------------------------------------------- #
def matmul_stats_kernel(p_ref, w_ref, conv_ref, stats_ref):
    # p_ref:     (1, tm, Kp)    matmul_dtype
    # w_ref:     (Kp, Cop)      matmul_dtype (constant index_map -> VMEM resident)
    # conv_ref:  (1, tm, Cop)   matmul_dtype (narrow intermediate)
    # stats_ref: (1, 1, 2, Cop) f32          row 0 = sum, row 1 = sum of squares
    acc = jnp.dot(p_ref[0], w_ref[...], preferred_element_type=jnp.float32)
    conv_ref[0] = acc.astype(conv_ref.dtype)
    s1 = jnp.sum(acc, axis=0, keepdims=True)
    s2 = jnp.sum(acc * acc, axis=0, keepdims=True)
    stats_ref[...] = jnp.concatenate([s1, s2], axis=0)[None, None]


# --------------------------------------------------------------------------- #
# Pass 2: fused BN affine + ELU + transpose-to-channels-first + cast.
# --------------------------------------------------------------------------- #
def bn_elu_kernel(conv_ref, scale_ref, shift_ref, o_ref):
    # conv_ref:    (1, tm, Cop)  matmul_dtype
    # scale/shift: (1, Cop)      f32
    # o_ref:       (1, Cop, tm)  x.dtype  (channels-first tile, lane-dense in tm)
    y = conv_ref[0].astype(jnp.float32) * scale_ref[...] + shift_ref[...]
    y = jnp.where(y > 0.0, y, jnp.exp(y) - 1.0)   # ELU, alpha = 1
    o_ref[0] = y.T.astype(o_ref.dtype)            # in-kernel transpose (XLU)


def extract_patches(x, dtype, ksize=3, stride=2):
    """im2col for a valid, stride-2 3D conv -> (N, Do*Ho*Wo, Cin*27) in `dtype`."""
    N, C, D, H, W = x.shape
    Do = (D - ksize) // stride + 1
    Ho = (H - ksize) // stride + 1
    Wo = (W - ksize) // stride + 1
    xc = x.astype(dtype)                                  # build taps narrow
    taps = []
    for kd in range(ksize):
        for kh in range(ksize):
            for kw in range(ksize):
                taps.append(xc[:, :,
                               kd:kd + stride * Do:stride,
                               kh:kh + stride * Ho:stride,
                               kw:kw + stride * Wo:stride])
    p = jnp.stack(taps, axis=-1)                # (N, C, Do, Ho, Wo, 27)
    p = jnp.transpose(p, (0, 2, 3, 4, 1, 5))    # (N, Do, Ho, Wo, C, 27)
    return p.reshape(N, Do * Ho * Wo, C * ksize ** 3), (Do, Ho, Wo)


def _pick_tile_m(DHW, Kp, Cop, mm_bytes, out_bytes, *, cap, budget):
    """Largest M tile (multiple of 128, <= cap and <= round_up(DHW,128)) whose
    double-buffered per-step VMEM footprint stays under `budget`."""
    limit = max(128, min(cap, _round_up(DHW, 128)))
    tm = 128
    cand = 128
    while cand <= limit:
        foot1 = (2 * cand * Kp * mm_bytes        # patch tile, double-buffered
                 + 2 * cand * Cop * mm_bytes     # conv-out tile, double-buffered
                 + 2 * Kp * Cop * mm_bytes       # weight block (2 bufs)
                 + 8 * Cop * 4)                  # stats
        foot2 = (2 * cand * Cop * mm_bytes       # conv tile in
                 + 2 * cand * Cop * out_bytes    # transposed out tile
                 + 4 * Cop * 4)                  # scale/shift
        if max(foot1, foot2) <= budget:
            tm = cand
        cand += 128
    return tm


def conv_down(x, weight, bias, gamma, beta, *,
              matmul_dtype=jnp.bfloat16,
              tile_m_cap=1024,              # v6e: 1024-2048 ok; v7x with Cin>=256 keep <=768
              vmem_budget_bytes=20 << 20):  # per-step footprint budget (v7x-safe)
    """Forward of ConvDown (elu=True, dropout=False path).

    x: (N, Cin, D, H, W); weight: (Cout, Cin, 3, 3, 3); gamma/beta: (Cout,).
    `bias` is accepted for API parity with the PyTorch module but unused: a
    per-channel constant cancels exactly in the training-mode BN mean subtraction.
    """
    del bias
    N, Cin, D, H, W = x.shape
    Co = weight.shape[0]

    patches, (Do, Ho, Wo) = extract_patches(x, matmul_dtype)   # (N, DHW, K)
    _, DHW, K = patches.shape

    Kp = _round_up(K, 128)     # lane-aligned contraction dim
    # NOTE: Cout is rounded up to 128 lanes; free for real layers (Co >= 128),
    # wasteful for tiny Co like the smoke test.
    # TODO(synk): for Co < 128, pack floor(128/Co) M-row groups into the lane
    # dim (matters most on v7x once HBM traffic is minimized).
    Cop = _round_up(Co, 128)

    mm_bytes = np.dtype(matmul_dtype).itemsize
    out_bytes = np.dtype(x.dtype).itemsize
    tm = _pick_tile_m(DHW, Kp, Cop, mm_bytes, out_bytes,
                      cap=tile_m_cap, budget=vmem_budget_bytes)
    DHWp = _round_up(DHW, tm)   # per-batch padded rows (tiles never cross batch)
    nt = DHWp // tm             # M tiles per batch element

    vmem_limit = int(min(64 << 20, max(32 << 20, 2 * vmem_budget_bytes)))

    # Padded tensors in exactly the layout the kernels read (already narrow dtype).
    p_pad = jnp.pad(patches, ((0, 0), (0, DHWp - DHW), (0, Kp - K)))
    w_mat = weight.reshape(Co, K).T.astype(matmul_dtype)   # (K, Co), K order (c,kd,kh,kw)
    w_pad = jnp.pad(w_mat, ((0, Kp - K), (0, Cop - Co)))

    # ---- Pass 1: tiled matmul + per-tile partial BN statistics --------------
    conv, stats = pl.pallas_call(
        matmul_stats_kernel,
        out_shape=(jax.ShapeDtypeStruct((N, DHWp, Cop), matmul_dtype),
                   jax.ShapeDtypeStruct((N, nt, 2, Cop), jnp.float32)),
        grid=(N, nt),
        in_specs=[pl.BlockSpec((1, tm, Kp), lambda n, j: (n, j, 0)),
                  # Weight block: constant index map -> stays VMEM resident.
                  # TODO(synk): pipeline_mode=pl.Buffered(1) would halve its VMEM
                  # footprint; left default-buffered for portability.
                  pl.BlockSpec((Kp, Cop), lambda n, j: (0, 0))],
        out_specs=(pl.BlockSpec((1, tm, Cop), lambda n, j: (n, j, 0)),
                   pl.BlockSpec((1, 1, 2, Cop), lambda n, j: (n, j, 0, 0))),
        compiler_params=pltpu.CompilerParams(
            dimension_semantics=("parallel", "parallel"),
            vmem_limit_bytes=vmem_limit),
    )(p_pad, w_pad)

    # ---- Combine tiny per-tile stats: true batch statistics over N*DHW rows --
    # Padded rows are exact zeros and contribute nothing to the sums.
    # TODO(synk): E[x^2]-E[x]^2 in f32 can cancel for |mean| >> std at huge M;
    # a Welford / mean-shifted per-tile combine would be more robust.
    totals = jnp.sum(stats, axis=(0, 1))            # (2, Cop)
    cnt = float(N * DHW)
    mean = totals[0] / cnt
    var = jnp.maximum(totals[1] / cnt - mean * mean, 0.0)
    inv = jax.lax.rsqrt(var + EPS)
    gamma_p = jnp.pad(gamma.astype(jnp.float32), (0, Cop - Co))
    beta_p = jnp.pad(beta.astype(jnp.float32), (0, Cop - Co))
    scale = (gamma_p * inv).reshape(1, Cop)
    shift = (beta_p - mean * gamma_p * inv).reshape(1, Cop)

    # ---- Pass 2: fused normalize + ELU, emitted channels-first in x.dtype ----
    out_cf = pl.pallas_call(
        bn_elu_kernel,
        out_shape=jax.ShapeDtypeStruct((N, Cop, DHWp), x.dtype),
        grid=(N, nt),
        in_specs=[pl.BlockSpec((1, tm, Cop), lambda n, j: (n, j, 0)),
                  pl.BlockSpec((1, Cop), lambda n, j: (0, 0)),
                  pl.BlockSpec((1, Cop), lambda n, j: (0, 0))],
        out_specs=pl.BlockSpec((1, Cop, tm), lambda n, j: (n, 0, j)),
        compiler_params=pltpu.CompilerParams(
            dimension_semantics=("parallel", "parallel"),
            vmem_limit_bytes=vmem_limit),
    )(conv, scale, shift)

    # Only strip padding; no wrapper transpose or dtype cast remains.
    return out_cf[:, :Co, :DHW].reshape(N, Co, Do, Ho, Wo)


def reference(x, weight, bias, gamma, beta):
    conv = jax.lax.conv_general_dilated(
        x, weight, window_strides=(2, 2, 2), padding='VALID',
        dimension_numbers=('NCDHW', 'OIDHW', 'NCDHW'))
    conv = conv + bias.reshape(1, -1, 1, 1, 1)
    mean = jnp.mean(conv, axis=(0, 2, 3, 4), keepdims=True)
    var = jnp.mean((conv - mean) ** 2, axis=(0, 2, 3, 4), keepdims=True)
    y = (conv - mean) * jax.lax.rsqrt(var + EPS)
    y = y * gamma.reshape(1, -1, 1, 1, 1) + beta.reshape(1, -1, 1, 1, 1)
    return jnp.where(y > 0, y, jnp.exp(y) - 1.0)


if __name__ == "__main__":
    key = jax.random.PRNGKey(0)
    kx, kw, kb, kg, kbe = jax.random.split(key, 5)

    N, Cin, S = 2, 4, 16
    Cout = 2 * Cin                                  # module overrides outChans = 2*inChans
    x = jax.random.normal(kx, (N, Cin, S, S, S), jnp.float32)
    weight = 0.1 * jax.random.normal(kw, (Cout, Cin, 3, 3, 3), jnp.float32)
    bias = 0.1 * jax.random.normal(kb, (Cout,), jnp.float32)
    gamma = 1.0 + 0.1 * jax.random.normal(kg, (Cout,), jnp.float32)
    beta = 0.1 * jax.random.normal(kbe, (Cout,), jnp.float32)

    ref = reference(x, weight, bias, gamma, beta)

    # Default (performance) path: bf16 MXU operands + bf16 conv intermediate,
    # f32 accumulation / stats / epilogue.
    out = conv_down(x, weight, bias, gamma, beta)
    jax.block_until_ready(out)
    assert out.shape == (N, Cout, 7, 7, 7), out.shape
    assert jnp.allclose(out, ref, atol=5e-2, rtol=5e-2), \
        float(jnp.max(jnp.abs(out - ref)))

    # f32 path (intermediate stays at matmul_dtype=f32) for a tight check.
    out_f32 = conv_down(x, weight, bias, gamma, beta, matmul_dtype=jnp.float32)
    jax.block_until_ready(out_f32)
    assert jnp.allclose(out_f32, ref, atol=1e-3, rtol=1e-3), \
        float(jnp.max(jnp.abs(out_f32 - ref)))

    print("KERNEL_OK")
</pallas_src>

<mosaic_0001>
module attributes {stable_mosaic.version = 11 : i64} {
  func.func @matmul_stats_kernel(%arg0: i32, %arg1: i32, %arg2: memref<1x384x128xbf16, #tpu.memory_space<vmem>>, %arg3: memref<128x128xbf16, #tpu.memory_space<vmem>>, %arg4: memref<1x384x128xbf16, #tpu.memory_space<vmem>>, %arg5: memref<1x1x2x128xf32, #tpu.memory_space<vmem>>) attributes {dimension_semantics = [#tpu.dimension_semantics<parallel>, #tpu.dimension_semantics<parallel>], iteration_bounds = array<i64: 2, 1>, scalar_prefetch = 0 : i64, scratch_operands = 0 : i64, tpu.core_type = #tpu.core_type<tc>, window_params = [{transform_indices = @transform_0, window_bounds = array<i64: 1, 384, 128>}, {pipeline_mode = #tpu.pipeline_mode<synchronous>, transform_indices = @transform_1, window_bounds = array<i64: 128, 128>}, {transform_indices = @transform_2, window_bounds = array<i64: 1, 384, 128>}, {transform_indices = @transform_3, window_bounds = array<i64: 1, 1, 2, 128>}]} {
    %c0 = arith.constant 0 : index
    %c0_0 = arith.constant 0 : index
    %c0_1 = arith.constant 0 : index
    %0 = vector.load %arg2[%c0, %c0_0, %c0_1] : memref<1x384x128xbf16, #tpu.memory_space<vmem>>, vector<1x384x128xbf16>
    %1 = vector.shape_cast %0 : vector<1x384x128xbf16> to vector<384x128xbf16>
    %c0_2 = arith.constant 0 : index
    %c0_3 = arith.constant 0 : index
    %2 = vector.load %arg3[%c0_2, %c0_3] : memref<128x128xbf16, #tpu.memory_space<vmem>>, vector<128x128xbf16>
    %cst = arith.constant dense<0.000000e+00> : vector<384x128xf32>
    %3 = tpu.matmul %1, %2, %cst {dimension_numbers = #tpu.dot_dimension_numbers<[1], [0], [0], [1], [0, 0, 1, 1], [], []>} : vector<384x128xbf16>, vector<128x128xbf16>, vector<384x128xf32> -> vector<384x128xf32>
    %4 = arith.truncf %3 : vector<384x128xf32> to vector<384x128xbf16>
    %c0_4 = arith.constant 0 : index
    %c0_5 = arith.constant 0 : index
    %c0_6 = arith.constant 0 : index
    %5 = vector.load %arg4[%c0_4, %c0_5, %c0_6] : memref<1x384x128xbf16, #tpu.memory_space<vmem>>, vector<1x384x128xbf16>
    %6 = vector.shape_cast %5 : vector<1x384x128xbf16> to vector<384x128xbf16>
    %7 = vector.shape_cast %4 : vector<384x128xbf16> to vector<1x384x128xbf16>
    tpu.vector_store %arg4[%c0_4, %c0_5, %c0_6], %7 {strides = array<i32>} : memref<1x384x128xbf16, #tpu.memory_space<vmem>>, vector<1x384x128xbf16>,
    %cst_7 = arith.constant dense<0.000000e+00> : vector<128xf32>
    %8 = vector.multi_reduction <add>, %3, %cst_7 [0] : vector<384x128xf32> to vector<128xf32>
    %9 = vector.shape_cast %8 : vector<128xf32> to vector<1x128xf32>
    %10 = arith.mulf %3, %3 : vector<384x128xf32>
    %cst_8 = arith.constant dense<0.000000e+00> : vector<128xf32>
    %11 = vector.multi_reduction <add>, %10, %cst_8 [0] : vector<384x128xf32> to vector<128xf32>
    %12 = vector.shape_cast %11 : vector<128xf32> to vector<1x128xf32>
    %13 = tpu.concatenate %9, %12 in 0 : vector<1x128xf32>, vector<1x128xf32> -> vector<2x128xf32>
    %14 = vector.shape_cast %13 : vector<2x128xf32> to vector<1x1x2x128xf32>
    %c0_9 = arith.constant 0 : index
    %c0_10 = arith.constant 0 : index
    %c0_11 = arith.constant 0 : index
    %c0_12 = arith.constant 0 : index
    %15 = vector.load %arg5[%c0_9, %c0_10, %c0_11, %c0_12] : memref<1x1x2x128xf32, #tpu.memory_space<vmem>>, vector<1x1x2x128xf32>
    tpu.vector_store %arg5[%c0_9, %c0_10, %c0_11, %c0_12], %14 {strides = array<i32>} : memref<1x1x2x128xf32, #tpu.memory_space<vmem>>, vector<1x1x2x128xf32>,
    return
  }
  func.func @transform_0(%arg0: i32, %arg1: i32) -> (i32, i32, i32) {
    %c0_i32 = arith.constant 0 : i32
    %c0_i32_0 = arith.constant 0 : i32
    return %arg0, %arg1, %c0_i32 : i32, i32, i32
  }
  func.func @transform_1(%arg0: i32, %arg1: i32) -> (i32, i32) {
    %c0_i32 = arith.constant 0 : i32
    %c0_i32_0 = arith.constant 0 : i32
    %c0_i32_1 = arith.constant 0 : i32
    return %c0_i32, %c0_i32_0 : i32, i32
  }
  func.func @transform_2(%arg0: i32, %arg1: i32) -> (i32, i32, i32) {
    %c0_i32 = arith.constant 0 : i32
    %c0_i32_0 = arith.constant 0 : i32
    return %arg0, %arg1, %c0_i32 : i32, i32, i32
  }
  func.func @transform_3(%arg0: i32, %arg1: i32) -> (i32, i32, i32, i32) {
    %c0_i32 = arith.constant 0 : i32
    %c0_i32_0 = arith.constant 0 : i32
    %c0_i32_1 = arith.constant 0 : i32
    return %arg0, %arg1, %c0_i32, %c0_i32_0 : i32, i32, i32, i32
  }
}

</mosaic_0001>

<bundles_post_ra>
// kernel: tpu_custom_call.1
= control target key start
LH: loop header
LB: loop body
LE: loop exit
PB: predicated region body
PF: predicated region fallthrough
CT: control target
= control target key end

     0   :  { %9 = vsyncpa [#allocation3], 0  ;;  %s2453_s0 = inlined_call_operand.hbm [shape: bf16[2,384,128], index: 0, kind: input, shape index: {}]   ;;  %s2454_s1 = inlined_call_operand.hbm [shape: bf16[128,128], index: 1, kind: input, shape index: {}]   ;;  %s2455_s2 = inlined_call_operand.hbm [shape: bf16[2,384,128], index: 2, kind: output, shape index: {0}]   ;;  %s2456_s3 = inlined_call_operand.hbm [shape: f32[2,1,2,128], index: 3, kind: output, shape index: {1}]  }
   0x1   :  { %11 = vsyncpa [#allocation3 + $0x1], 0 }
   0x2   :  { %12 = vsyncpa [#allocation6], 0 }
   0x3   :  { %13 = vsyncpa [#allocation4], 0 }
   0x4   :  { %15 = vsyncpa [#allocation4 + $0x1], 0 }
   0x5   :  { %16 = vsyncpa [#allocation9], 0 }
   0x6   :  { %18 = vsyncpa [#allocation9 + $0x1], 0  ;;  %s2002_s12 = smov 0   ;;  %s2004_s13 = smov 0  }
   0x7   :  { %s2006_s14 = smov 0   ;;  %s2008_s15 = smov 0  }
   0x8   :  { %s2010_s16 = smov 0   ;;  %s2012_s17 = smov 0  }
   0x9 LB: > { %s1281_s18 = sadd.s32 4294967295, %s1972_s17   ;;  %s1282_s19 = sadd.s32 4294967294, %s1972_s17   ;;  %s1972_s17 = sphi %s2012_s17, %s24_s17   ;;  %s1968_s16 = sphi %s2010_s16, %s2479_s16   ;;  %s1964_s15 = sphi %s2008_s15, %s2478_s15   ;;  %s1960_s14 = sphi %s2006_s14, %s2477_s14   ;;  %s1956_s13 = sphi %s2004_s13, %s2476_s13   ;;  %s1952_s12 = sphi %s2002_s12, %s2475_s12  }
   0xa   : > { %p58_p0 = scmp.ne.s32.totalorder %s1956_s13, %s1952_s12  ;;  %p2036_p1 = scmp.eq.s32.totalorder %s1281_s18, 0 }
   0xb   : > { %p2040_p2 = scmp.eq.s32.totalorder %s1281_s18, 1  ;;  %p111_p3 = scmp.eq.s32.totalorder %s1282_s19, 1 }
   0xc   : > { %s2461_s20 = scalar_select %p2036_p1, 1, 0 }
   0xd   : > { %s2462_s21 = scalar_select %p2040_p2, 1, 0 }
   0xe   : > { %p2046_p4 = por %p2036_p1, %p58_p0  ;;  %p1283_p5 = scmp.ge.s32.totalorder %s1972_s17, 1 }
   0xf   : > { %p2051_p6 = por %p111_p3, %p58_p0  ;;  %p146_p7 = scmp.lt.s32.totalorder %s1972_s17, 3 }
  0x10   : > { %s2463_s22 = scalar_select %p2046_p4, 1, 0 }
  0x11   : > { %s2464_s23 = scalar_select %p2051_p6, 1, 0 }
  0x12   : > { %p2056_p8 = pnand %p1283_p5, %p146_p7  ;;  %s1974_s25 = smov [#allocation5]  }
  0x13   : > { %s158_s26 = sshll.u32 %s1974_s25, 4  ;;  %s36_s28 = sadd.s32 1, %s1968_s16  ;;  %s159_s26 = int_to_ptr.vmem [resolvable:$true] %s158_s26 }
  0x14   : > { %s2465_s24 = scalar_select %p2056_p8, 1, 0 }
  0x15   : > { %p1692_p9 = pneg %p2056_p8  ;;  %s1796_s4 = scalar_lea.hbm %s2454_s1, 1024 }
  0x16   : > { %p1797_p12 = scmp.ne.s32.totalorder %s2454_s1, %s1796_s4  ;;  %p1803_p5 = scmp.lt.u32.totalorder %s1796_s4, %s2454_s1 }
  0x17   : > { %p2065_p11 = pnand %p1692_p9, %p2036_p1 }
  0x19   : > { %p1798_p13 = pneg %p2065_p11 }
  0x1b   : > { %p1799_p0 = pnand %p1798_p13, %p1797_p12 }
  0x1d   : > { %p1800_p3 = pneg %p1799_p0 }
  0x1f   : > { %p1805_p7 = pnand %p1803_p5, %p1800_p3 }
  0x21   : > { %1808 = shalt.err (!%p1805_p7)
}
  0x22   : > { %s1809_s9 = scalar_lea.vmem %s159_s26, 1024  ;;  %p1817_p1 = scmp.lt.s32.totalorder %s159_s26, %s159_s26 }
  0x23   : > { %p1810_p9 = scmp.ne.s32.totalorder %s159_s26, %s1809_s9  ;;  %p1818_p4 = scmp.lt.s32.totalorder %s1809_s9, %s1809_s9 }
  0x25   : > { %p1812_p10 = pnand %p1810_p9, %p1798_p13  ;;  %p1819_p8 = por %p1818_p4, %p1817_p1 }
  0x27   : > { %p1813_p6 = pneg %p1812_p10 }
  0x29   : > { %p1820_p2 = pnand %p1819_p8, %p1813_p6 }
  0x2b   : > { %1823 = shalt.err (!%p1820_p2)
}
  0x2c   : > { %s1975_s10 = smov 64   ;;  %s1976_s11 = smov 4  }
  0x2d   : > { %1695 = dma.hbm_to_vmem [thread:$0]  (!%p2065_p11), %s2454_s1, 1024, %s159_s26, [#allocation6], %s1975_s10, %s1975_s10, %s1976_s11  }
  0x2e   : > { %p38_p1 = scmp.ge.s32.totalorder %s36_s28, 2  ;;  %s45_s25 = sadd.s32 1, %s1960_s14 }
  0x2f   : > { %p52_p2 = scmp.ne.s32.totalorder %s1960_s14, %s1956_s13  ;;  %p53_p4 = scmp.eq.s32.totalorder %s1972_s17, 0 }
  0x30   : > { %s2481_s28 = smov (%p38_p1, %s36_s28), 0  ;;  %p2467_p8 = scmp.ne.s32.totalorder %s2462_s21, 0 }
  0x31   : > { %p54_p6 = por %p53_p4, %p52_p2  ;;  %s40_s27 = ssub.s32 %s1968_s16, %s2481_s28 }
  0x32   : > { %p2097_p10 = por %p2467_p8, %p52_p2  ;;  %p1708_p12 = scmp.lt.s32.totalorder %s1972_s17, 2 }
  0x33   : > { %p43_p13 = scmp.eq.s32.totalorder %s40_s27, 0  ;;  %s172_s30 = sand.u32 1, %s1960_s14  }
  0x34   : > { %s1678_s4 = smul.u32 192, %s172_s30  ;;  %p2109_p11 = pnand %p1708_p12, %p54_p6 }
  0x35   : > { %s2106_s5 = scalar_select %p43_p13, %s1960_s14, %s45_s25  }
  0x36   : > { %s1679_s26 = smul.u32 3072, %s1968_s16  ;;  %s176_s6 = scalar_lea.vmem [#allocation2], %s1678_s4 }
  0x37   : > { %s185_s7 = sshll.u32 %s176_s6, 4  ;;  %s2120_s19 = scalar_lea.sflag [#allocation3], %s172_s30  ;;  %s2118_s7 = int_to_ptr.vmem [resolvable:$true] %s185_s7 }
  0x38   : > { %s2116_s18 = scalar_lea.hbm %s2453_s0, %s1679_s26  ;;  %p1826_p3 = pneg %p2109_p11 }
  0x39   : > { %s1824_s25 = scalar_lea.hbm %s2116_s18, 3072  ;;  %s1829_s26 = scalar_lea.hbm %s2453_s0, 6144 }
  0x3a   : > { %p1825_p0 = scmp.ne.s32.totalorder %s2116_s18, %s1824_s25  ;;  %p1830_p9 = scmp.lt.u32.totalorder %s2116_s18, %s2453_s0 }
  0x3b   : > { %p1831_p1 = scmp.lt.u32.totalorder %s1829_s26, %s1824_s25  ;;  %p1833_p4 = scmp.lt.u32.totalorder %s1824_s25, %s2116_s18 }
  0x3c   : > { %p1827_p5 = pnand %p1826_p3, %p1825_p0 }
  0x3d   : > { %p1832_p2 = por %p1831_p1, %p1830_p9 }
  0x3e   : > { %p1828_p7 = pneg %p1827_p5 }
  0x3f   : > { %p1834_p6 = por %p1833_p4, %p1832_p2 }
  0x41   : > { %p1835_p8 = pnand %p1834_p6, %p1828_p7 }
  0x43   : > { %1838 = shalt.err (!%p1835_p8)
}
  0x44   : > { %s1839_s30 = scalar_lea.vmem %s2118_s7, 3072  ;;  %s1977_s21 = smov [#allocation2]  }
  0x45   : > { %p1840_p12 = scmp.ne.s32.totalorder %s2118_s7, %s1839_s30  ;;  %s1844_s27 = sshll.u32 %s1977_s21, 4  ;;  %s1845_s27 = int_to_ptr.vmem [resolvable:$false] %s1844_s27 }
  0x46   : > { %s1846_s4 = scalar_lea.vmem %s1845_s27, 6144  ;;  %p1847_p5 = scmp.lt.s32.totalorder %s2118_s7, %s1845_s27 }
  0x47   : > { %p1842_p13 = pnand %p1840_p12, %p1826_p3  ;;  %p1848_p9 = scmp.lt.s32.totalorder %s1846_s4, %s1839_s30 }
  0x49   : > { %p1843_p0 = pneg %p1842_p13  ;;  %p1849_p1 = por %p1848_p9, %p1847_p5 }
  0x4b   : > { %p1850_p2 = pnand %p1849_p1, %p1843_p0 }
  0x4d   : > { %1853 = shalt.err (!%p1850_p2)
}
  0x4e   : > { %1699 = dma.hbm_to_vmem [thread:$0]  (!%p2109_p11), %s2116_s18, 3072, %s2118_s7, %s2120_s19, %s1975_s10, %s1975_s10, %s1976_s11  }
  0x4f   : > { %p2470_p3 = scmp.ne.s32.totalorder %s2465_s24, 0 }
  0x50   : > { %s2154_s25 = sand.u32 (!%p2470_p3), 1, %s1956_s13   ;;  %p2471_p7 = scmp.ne.s32.totalorder (!%p2470_p3), %s2463_s22, 0 }
  0x51   : > { %197 = sbr.rel (%p2470_p3) target bundleno = 474 (0x1da), region = 28  ;;  %s200_s6 = scalar_lea.sflag (!%p2470_p3), [#allocation3], %s2154_s25 }
  0x52   : > { %s1680_s26 = smul.u32 (!%p2470_p3), 192, %s2154_s25 }
  0x54   : > { %s2160_s8 = scalar_lea.vmem (!%p2470_p3), [#allocation2], %s1680_s26 }
  0x58   : > { %1935 = dma.done.wait (%p2471_p7), %s200_s6, 3072  }
  0x59   : > { %1937 = vsyncadd (%p2471_p7), %s200_s6, 4294964224  ;;  %p2472_p11 = scmp.ne.s32.totalorder %s2461_s20, 0 }
  0x5b   : > { %1939 = dma.done.wait (%p2472_p11), [#allocation6], 1024  }
  0x5c   : > { %1941 = vsyncadd (%p2472_p11), [#allocation6], 4294966272  ;;  %v1764_v0 = vld [vmem:[#allocation5] sm:$0xff]   ;;  %v1765_v1 = vld [vmem:[#allocation5 + $0x8] sm:$0xff]   ;;  %s2208_s20 = scalar_lea.vmem [#allocation7], %s1680_s26  ;;  %s1681_s22 = smul.u32 3072, %s1964_s15 }
  0x5d   : > { %1598 = vmatprep.subr.bf16.mxu0 %v1764_v0  ;;  %1662 = vmatprep.subr.bf16.mxu1 %v1764_v0  ;;  %v1766_v2 = vld [vmem:[#allocation5 + $0x10] sm:$0xff]   ;;  %v1767_v3 = vld [vmem:[#allocation5 + $0x18] sm:$0xff]   ;;  %v1772_v4 = vld [vmem:[%s2160_s8] sm:$0xff]   ;;  %s1137_s24 = sshll.u32 %s2208_s20, 4  ;;  %s1117_s18 = scalar_lea.sflag [#allocation4], %s2154_s25  ;;  %s2299_s24 = int_to_ptr.vmem [resolvable:$true] %s1137_s24 }
  0x5e   : > { %1599 = vmatpush3.bf16.msra.mxu0 %v1764_v0  ;;  %1670 = vmatpush3.bf16.msra.mxu1 %v1764_v0  ;;  %v1768_v5 = vld [vmem:[#allocation5 + $0x20] sm:$0xff]   ;;  %v1769_v6 = vld [vmem:[#allocation5 + $0x28] sm:$0xff]   ;;  %v1770_v7 = vld [vmem:[#allocation5 + $0x30] sm:$0xff]   ;;  %s2293_s7 = scalar_lea.hbm %s2455_s2, %s1681_s22  ;;  %s1854_s19 = scalar_lea.vmem %s2299_s24, 3072 }
  0x5f   : > { %1600 = vmatprep.subr.bf16.mxu0 %v1765_v1  ;;  %1663 = vmatprep.subr.bf16.mxu1 %v1765_v1  ;;  %v1784_v8 = vld [vmem:[%s2160_s8 + $0x60] sm:$0xff]   ;;  %v1771_v9 = vld [vmem:[#allocation5 + $0x38] sm:$0xff]   ;;  %v1773_v10 = vld [vmem:[%s2160_s8 + $0x8] sm:$0xff]   ;;  %p1855_p4 = scmp.ne.s32.totalorder %s2299_s24, %s1854_s19  ;;  %s1978_s9 = smov [#allocation7]  }
  0x60   : > { %1614 = vmatprep.mubr.bf16.mxu0 %v1772_v4  ;;  %1638 = vmatprep.mubr.bf16.mxu1 %v1784_v8  ;;  %v1774_v11 = vld [vmem:[%s2160_s8 + $0x10] sm:$0xff]   ;;  %v1785_v12 = vld [vmem:[%s2160_s8 + $0x68] sm:$0xff]   ;;  %v1775_v14 = vld [vmem:[%s2160_s8 + $0x18] sm:$0xff]   ;;  %s1858_s30 = sshll.u32 %s1978_s9, 4  ;;  %s1859_s30 = int_to_ptr.vmem [resolvable:$false] %s1858_s30 }
  0x61   : > { %v1786_v13 = vld [vmem:[%s2160_s8 + $0x70] sm:$0xff]   ;;  %v1787_v15 = vld [vmem:[%s2160_s8 + $0x78] sm:$0xff]   ;;  %v1776_v16 = vld [vmem:[%s2160_s8 + $0x20] sm:$0xff]   ;;  %p1856_p6 = pnand %p1855_p4, %p2097_p10  ;;  %s1860_s21 = scalar_lea.vmem %s1859_s30, 6144 }
  0x62   : > { %1601 = vmatpush3.bf16.msra.mxu0 %v1765_v1  ;;  %1671 = vmatpush3.bf16.msra.mxu1 %v1765_v1  ;;  %v1788_v17 = vld [vmem:[%s2160_s8 + $0x80] sm:$0xff]   ;;  %v1777_v18 = vld [vmem:[%s2160_s8 + $0x28] sm:$0xff]   ;;  %v1778_v20 = vld [vmem:[%s2160_s8 + $0x30] sm:$0xff]   ;;  %p1861_p12 = scmp.lt.s32.totalorder %s2299_s24, %s1859_s30  ;;  %p1862_p13 = scmp.lt.s32.totalorder %s1860_s21, %s1854_s19 }
  0x63   : > { %1602 = vmatprep.subr.bf16.mxu0 %v1766_v2  ;;  %1664 = vmatprep.subr.bf16.mxu1 %v1766_v2  ;;  %v1789_v19 = vld [vmem:[%s2160_s8 + $0x88] sm:$0xff]   ;;  %v1790_v21 = vld [vmem:[%s2160_s8 + $0x90] sm:$0xff]   ;;  %v1779_v22 = vld [vmem:[%s2160_s8 + $0x38] sm:$0xff]   ;;  %p1857_p8 = pneg %p1856_p6 }
  0x64   : > { %v1791_v23 = vld [vmem:[%s2160_s8 + $0x98] sm:$0xff]   ;;  %v1780_v24 = vld [vmem:[%s2160_s8 + $0x40] sm:$0xff]   ;;  %v1781_v26 = vld [vmem:[%s2160_s8 + $0x48] sm:$0xff]   ;;  %p1863_p0 = por %p1862_p13, %p1861_p12 }
  0x65   : > { %v1792_v25 = vld [vmem:[%s2160_s8 + $0xa0] sm:$0xff]   ;;  %v1793_v27 = vld [vmem:[%s2160_s8 + $0xa8] sm:$0xff]   ;;  %v1782_v28 = vld [vmem:[%s2160_s8 + $0x50] sm:$0xff]  }
  0x66   : > { %1603 = vmatpush3.bf16.msra.mxu0 %v1766_v2  ;;  %1672 = vmatpush3.bf16.msra.mxu1 %v1766_v2  ;;  %v1794_v29 = vld [vmem:[%s2160_s8 + $0xb0] sm:$0xff]   ;;  %v1783_v30 = vld [vmem:[%s2160_s8 + $0x58] sm:$0xff]   ;;  %p1864_p5 = pnand %p1863_p0, %p1857_p8 }
  0x67   : > { %1604 = vmatprep.subr.bf16.mxu0 %v1767_v3  ;;  %1665 = vmatprep.subr.bf16.mxu1 %v1767_v3  ;;  %v1795_v31 = vld [vmem:[%s2160_s8 + $0xb8] sm:$0xff]  }
  0x6a   : > { %1605 = vmatpush3.bf16.msra.mxu0 %v1767_v3  ;;  %1673 = vmatpush3.bf16.msra.mxu1 %v1767_v3 }
  0x6b   : > { %1606 = vmatprep.subr.bf16.mxu0 %v1768_v5  ;;  %1666 = vmatprep.subr.bf16.mxu1 %v1768_v5 }
  0x6e   : > { %1607 = vmatpush3.bf16.msra.mxu0 %v1768_v5  ;;  %1674 = vmatpush3.bf16.msra.mxu1 %v1768_v5 }
  0x6f   : > { %1608 = vmatprep.subr.bf16.mxu0 %v1769_v6  ;;  %1667 = vmatprep.subr.bf16.mxu1 %v1769_v6 }
  0x72   : > { %1609 = vmatpush3.bf16.msra.mxu0 %v1769_v6  ;;  %1675 = vmatpush3.bf16.msra.mxu1 %v1769_v6 }
  0x73   : > { %1610 = vmatprep.subr.bf16.mxu0 %v1770_v7  ;;  %1668 = vmatprep.subr.bf16.mxu1 %v1770_v7 }
  0x76   : > { %1611 = vmatpush3.bf16.msra.mxu0 %v1770_v7  ;;  %1676 = vmatpush3.bf16.msra.mxu1 %v1770_v7 }
  0x77   : > { %1612 = vmatprep.subr.bf16.mxu0 %v1771_v9  ;;  %1669 = vmatprep.subr.bf16.mxu1 %v1771_v9 }
  0x7a   : > { %1613 = vmatpush3.bf16.msra.mxu0 %v1771_v9  ;;  %1677 = vmatpush3.bf16.msra.mxu1 %v1771_v9 }
  0x7d   : > { %1615 = vmatmul.mubr.bf16.vlgmr.msra.gmra.mrb[0].mxu0 %v1773_v10  ;;  %1639 = vmatmul.mubr.bf16.vlgmr.msra.gmra.mrb[0].mxu1 %v1785_v12 }
  0x7e   : > { %1618 = vmatprep.mubr.bf16.mxu0 %v1774_v11  ;;  %1642 = vmatprep.mubr.bf16.mxu1 %v1786_v13 }
  0x85   : > { %1619 = vmatmul.mubr.bf16.gmra.mrb[4].mxu0 %v1775_v14  ;;  %1643 = vmatmul.mubr.bf16.gmra.mrb[4].mxu1 %v1787_v15 }
  0x86   : > { %1622 = vmatprep.mubr.bf16.mxu0 %v1776_v16  ;;  %1646 = vmatprep.mubr.bf16.mxu1 %v1788_v17 }
  0x8d   : > { %1623 = vmatmul.mubr.bf16.gmra.mrb[8].mxu0 %v1777_v18  ;;  %1647 = vmatmul.mubr.bf16.gmra.mrb[8].mxu1 %v1789_v19 }
  0x8e   : > { %1626 = vmatprep.mubr.bf16.mxu0 %v1778_v20  ;;  %1650 = vmatprep.mubr.bf16.mxu1 %v1790_v21 }
  0x95   : > { %1627 = vmatmul.mubr.bf16.gmra.mrb[12].mxu0 %v1779_v22  ;;  %1651 = vmatmul.mubr.bf16.gmra.mrb[12].mxu1 %v1791_v23 }
  0x96   : > { %1630 = vmatprep.mubr.bf16.mxu0 %v1780_v24  ;;  %1654 = vmatprep.mubr.bf16.mxu1 %v1792_v25 }
  0x9d   : > { %1631 = vmatmul.mubr.bf16.gmra.mrb[16].mxu0 %v1781_v26  ;;  %1655 = vmatmul.mubr.bf16.gmra.mrb[16].mxu1 %v1793_v27 }
  0x9e   : > { %1634 = vmatprep.mubr.bf16.mxu0 %v1782_v28  ;;  %1658 = vmatprep.mubr.bf16.mxu1 %v1794_v29 }
  0xa5   : > { %1635 = vmatmul.mubr.bf16.gmra.mrb[20].mxu0 %v1783_v30  ;;  %1659 = vmatmul.mubr.bf16.gmra.mrb[20].mxu1 %v1795_v31 }
 0x150   : > { %v1616_v32 = vpop.f32.mrb[0].mxu0  ;;  %v2194_v33 = vpop.f32.mrb[0].mxu1 }
 0x151   : > { %v528_v34 = vpop.f32.mrb[1].mxu0  ;;  %v2196_v35 = vpop.f32.mrb[1].mxu1  ;;  %v1014_v47 = vmul.f32 %v1616_v32, %v1616_v32 }
 0x152   : > { %v1617_v36 = vpop.f32.mrb[2].mxu0  ;;  %v2198_v37 = vpop.f32.mrb[2].mxu1  ;;  %v1012_v38 = vmul.f32 %v528_v34, %v528_v34 }
 0x153   : > { %v1431_v39 = vpack.c.bf16 %v1617_v36, %v1616_v32  ;;  %v531_v40 = vpop.f32.mrb[3].mxu0  ;;  %v1491_v41 = vpack.c.bf16 %v2198_v37, %v2194_v33  ;;  %v2202_v42 = vpop.f32.mrb[3].mxu1  ;;  %v1015_v50 = vmul.f32 %v1617_v36, %v1617_v36 }
 0x154   : > { %v1426_v43 = vpack.c.bf16 %v531_v40, %v528_v34  ;;  %v959_v44 = vadd.f32 %v531_v40, %v528_v34  ;;  %v1013_v45 = vmul.f32 %v531_v40, %v531_v40  ;;  %v1486_v46 = vpack.c.bf16 %v2202_v42, %v2196_v35 }
 0x155   : > { %1543 = vst [vmem:[%s2208_s20 + $0x8] sm:$0xff] %v1431_v39   ;;  %1555 = vst [vmem:[%s2208_s20 + $0x68] sm:$0xff] %v1491_v41  }
 0x156   : > { %1427 = vst [vmem:[%s2208_s20] sm:$0xff] %v1426_v43   ;;  %v960_v48 = vadd.f32 %v1616_v32, %v959_v44  ;;  %v1060_v49 = vadd.f32 %v1013_v45, %v1012_v38  ;;  %1554 = vst [vmem:[%s2208_s20 + $0x60] sm:$0xff] %v1486_v46  }
 0x158   : > { %v1061_v51 = vadd.f32 %v1060_v49, %v1014_v47  ;;  %v1620_v52 = vpop.f32.mrb[4].mxu0  ;;  %v961_v53 = vadd.f32 %v1617_v36, %v960_v48  ;;  %v2214_v54 = vpop.f32.mrb[4].mxu1 }
 0x159   : > { %v544_v55 = vpop.f32.mrb[5].mxu0  ;;  %v2216_v56 = vpop.f32.mrb[5].mxu1  ;;  %v1018_v7 = vmul.f32 %v1620_v52, %v1620_v52 }
 0x15a   : > { %v962_v57 = vadd.f32 %v961_v53, %v544_v55  ;;  %v1016_v58 = vmul.f32 %v544_v55, %v544_v55  ;;  %v1062_v59 = vadd.f32 %v1061_v51, %v1015_v50  ;;  %v1621_v60 = vpop.f32.mrb[6].mxu0  ;;  %v2218_v61 = vpop.f32.mrb[6].mxu1 }
 0x15b   : > { %v1441_v62 = vpack.c.bf16 %v1621_v60, %v1620_v52  ;;  %v547_v63 = vpop.f32.mrb[7].mxu0  ;;  %v1501_v0 = vpack.c.bf16 %v2218_v61, %v2214_v54  ;;  %v2222_v1 = vpop.f32.mrb[7].mxu1  ;;  %v1019_v10 = vmul.f32 %v1621_v60, %v1621_v60 }
 0x15c   : > { %v1063_v2 = vadd.f32 %v1062_v59, %v1016_v58  ;;  %v1436_v3 = vpack.c.bf16 %v547_v63, %v544_v55  ;;  %v963_v4 = vadd.f32 %v962_v57, %v547_v63  ;;  %v1017_v5 = vmul.f32 %v547_v63, %v547_v63 }
 0x15d   : > { %1545 = vst [vmem:[%s2208_s20 + $0x18] sm:$0xff] %v1441_v62   ;;  %1557 = vst [vmem:[%s2208_s20 + $0x78] sm:$0xff] %v1501_v0   ;;  %v1496_v6 = vpack.c.bf16 %v2222_v1, %v2216_v56 }
 0x15e   : > { %1544 = vst [vmem:[%s2208_s20 + $0x10] sm:$0xff] %v1436_v3   ;;  %v964_v8 = vadd.f32 %v1620_v52, %v963_v4  ;;  %v1064_v9 = vadd.f32 %v1063_v2, %v1017_v5 }
 0x15f   : > { %1556 = vst [vmem:[%s2208_s20 + $0x70] sm:$0xff] %v1496_v6  }
 0x160   : > { %v1065_v11 = vadd.f32 %v1064_v9, %v1018_v7  ;;  %v1624_v12 = vpop.f32.mrb[8].mxu0  ;;  %v965_v13 = vadd.f32 %v1621_v60, %v964_v8  ;;  %v2230_v14 = vpop.f32.mrb[8].mxu1 }
 0x161   : > { %v560_v15 = vpop.f32.mrb[9].mxu0  ;;  %v2232_v16 = vpop.f32.mrb[9].mxu1  ;;  %v1022_v31 = vmul.f32 %v1624_v12, %v1624_v12 }
 0x162   : > { %v966_v17 = vadd.f32 %v965_v13, %v560_v15  ;;  %v1020_v18 = vmul.f32 %v560_v15, %v560_v15  ;;  %v1066_v19 = vadd.f32 %v1065_v11, %v1019_v10  ;;  %v1625_v20 = vpop.f32.mrb[10].mxu0  ;;  %v2234_v21 = vpop.f32.mrb[10].mxu1 }
 0x163   : > { %v1451_v22 = vpack.c.bf16 %v1625_v20, %v1624_v12  ;;  %v563_v23 = vpop.f32.mrb[11].mxu0  ;;  %v1511_v24 = vpack.c.bf16 %v2234_v21, %v2230_v14  ;;  %v2238_v25 = vpop.f32.mrb[11].mxu1  ;;  %v1023_v36 = vmul.f32 %v1625_v20, %v1625_v20 }
 0x164   : > { %v1067_v26 = vadd.f32 %v1066_v19, %v1020_v18  ;;  %v1446_v27 = vpack.c.bf16 %v563_v23, %v560_v15  ;;  %v967_v28 = vadd.f32 %v966_v17, %v563_v23  ;;  %v1021_v29 = vmul.f32 %v563_v23, %v563_v23 }
 0x165   : > { %1547 = vst [vmem:[%s2208_s20 + $0x28] sm:$0xff] %v1451_v22   ;;  %1559 = vst [vmem:[%s2208_s20 + $0x88] sm:$0xff] %v1511_v24   ;;  %v1506_v30 = vpack.c.bf16 %v2238_v25, %v2232_v16 }
 0x166   : > { %1546 = vst [vmem:[%s2208_s20 + $0x20] sm:$0xff] %v1446_v27   ;;  %v968_v32 = vadd.f32 %v1624_v12, %v967_v28  ;;  %v1068_v34 = vadd.f32 %v1067_v26, %v1021_v29 }
 0x167   : > { %1558 = vst [vmem:[%s2208_s20 + $0x80] sm:$0xff] %v1506_v30  }
 0x168   : > { %v1069_v38 = vadd.f32 %v1068_v34, %v1022_v31  ;;  %v1628_v39 = vpop.f32.mrb[12].mxu0  ;;  %v969_v40 = vadd.f32 %v1625_v20, %v968_v32  ;;  %v2246_v41 = vpop.f32.mrb[12].mxu1 }
 0x169   : > { %v576_v43 = vpop.f32.mrb[13].mxu0  ;;  %v2248_v44 = vpop.f32.mrb[13].mxu1  ;;  %v1026_v62 = vmul.f32 %v1628_v39, %v1628_v39 }
 0x16a   : > { %v970_v45 = vadd.f32 %v969_v40, %v576_v43  ;;  %v1024_v46 = vmul.f32 %v576_v43, %v576_v43  ;;  %v1070_v47 = vadd.f32 %v1069_v38, %v1023_v36  ;;  %v1629_v48 = vpop.f32.mrb[14].mxu0  ;;  %v2250_v49 = vpop.f32.mrb[14].mxu1 }
 0x16b   : > { %v1461_v50 = vpack.c.bf16 %v1629_v48, %v1628_v39  ;;  %v579_v51 = vpop.f32.mrb[15].mxu0  ;;  %v1521_v52 = vpack.c.bf16 %v2250_v49, %v2246_v41  ;;  %v2254_v53 = vpop.f32.mrb[15].mxu1  ;;  %v1027_v2 = vmul.f32 %v1629_v48, %v1629_v48 }
 0x16c   : > { %v1071_v55 = vadd.f32 %v1070_v47, %v1024_v46  ;;  %v1456_v57 = vpack.c.bf16 %v579_v51, %v576_v43  ;;  %v971_v58 = vadd.f32 %v970_v45, %v579_v51  ;;  %v1025_v59 = vmul.f32 %v579_v51, %v579_v51 }
 0x16d   : > { %1549 = vst [vmem:[%s2208_s20 + $0x38] sm:$0xff] %v1461_v50   ;;  %1561 = vst [vmem:[%s2208_s20 + $0x98] sm:$0xff] %v1521_v52   ;;  %v1516_v60 = vpack.c.bf16 %v2254_v53, %v2248_v44 }
 0x16e   : > { %1548 = vst [vmem:[%s2208_s20 + $0x30] sm:$0xff] %v1456_v57   ;;  %v972_v63 = vadd.f32 %v1628_v39, %v971_v58  ;;  %v1072_v0 = vadd.f32 %v1071_v55, %v1025_v59 }
 0x16f   : > { %1560 = vst [vmem:[%s2208_s20 + $0x90] sm:$0xff] %v1516_v60  }
 0x170   : > { %v1073_v3 = vadd.f32 %v1072_v0, %v1026_v62  ;;  %v1632_v4 = vpop.f32.mrb[16].mxu0  ;;  %v973_v5 = vadd.f32 %v1629_v48, %v972_v63  ;;  %v2262_v6 = vpop.f32.mrb[16].mxu1 }
 0x171   : > { %v592_v7 = vpop.f32.mrb[17].mxu0  ;;  %v2264_v8 = vpop.f32.mrb[17].mxu1  ;;  %v1030_v27 = vmul.f32 %v1632_v4, %v1632_v4 }
 0x172   : > { %v974_v9 = vadd.f32 %v973_v5, %v592_v7  ;;  %v1028_v10 = vmul.f32 %v592_v7, %v592_v7  ;;  %v1074_v11 = vadd.f32 %v1073_v3, %v1027_v2  ;;  %v1633_v12 = vpop.f32.mrb[18].mxu0  ;;  %v2266_v13 = vpop.f32.mrb[18].mxu1  ;;  %v1036_v5 = vmul.f32 %v2196_v35, %v2196_v35 }
 0x173   : > { %v1471_v15 = vpack.c.bf16 %v1633_v12, %v1632_v4  ;;  %v595_v17 = vpop.f32.mrb[19].mxu0  ;;  %v1531_v18 = vpack.c.bf16 %v2266_v13, %v2262_v6  ;;  %v2270_v19 = vpop.f32.mrb[19].mxu1  ;;  %v1031_v30 = vmul.f32 %v1633_v12, %v1633_v12 }
 0x174   : > { %v1075_v20 = vadd.f32 %v1074_v11, %v1028_v10  ;;  %v1466_v22 = vpack.c.bf16 %v595_v17, %v592_v7  ;;  %v975_v23 = vadd.f32 %v974_v9, %v595_v17  ;;  %v1029_v24 = vmul.f32 %v595_v17, %v595_v17 }
 0x175   : > { %1551 = vst [vmem:[%s2208_s20 + $0x48] sm:$0xff] %v1471_v15   ;;  %1563 = vst [vmem:[%s2208_s20 + $0xa8] sm:$0xff] %v1531_v18   ;;  %v1526_v26 = vpack.c.bf16 %v2270_v19, %v2264_v8 }
 0x176   : > { %1550 = vst [vmem:[%s2208_s20 + $0x40] sm:$0xff] %v1466_v22   ;;  %v976_v28 = vadd.f32 %v1632_v4, %v975_v23  ;;  %v1076_v29 = vadd.f32 %v1075_v20, %v1029_v24 }
 0x177   : > { %1562 = vst [vmem:[%s2208_s20 + $0xa0] sm:$0xff] %v1526_v26  }
 0x178   : > { %v1077_v31 = vadd.f32 %v1076_v29, %v1030_v27  ;;  %v1636_v32 = vpop.f32.mrb[20].mxu0  ;;  %v977_v34 = vadd.f32 %v1633_v12, %v976_v28  ;;  %v2278_v36 = vpop.f32.mrb[20].mxu1 }
 0x179   : > { %v608_v38 = vpop.f32.mrb[21].mxu0  ;;  %v2281_v39 = vpop.f32.mrb[21].mxu1  ;;  %v1034_v62 = vmul.f32 %v1636_v32, %v1636_v32 }
 0x17a   : > { %v978_v40 = vadd.f32 %v977_v34, %v608_v38  ;;  %v1032_v43 = vmul.f32 %v608_v38, %v608_v38  ;;  %v1078_v45 = vadd.f32 %v1077_v31, %v1031_v30  ;;  %v1637_v46 = vpop.f32.mrb[22].mxu0  ;;  %v2283_v47 = vpop.f32.mrb[22].mxu1 }
 0x17b   : > { %v1481_v48 = vpack.c.bf16 %v1637_v46, %v1636_v32  ;;  %v611_v50 = vpop.f32.mrb[23].mxu0  ;;  %v1541_v51 = vpack.c.bf16 %v2283_v47, %v2278_v36  ;;  %v2288_v52 = vpop.f32.mrb[23].mxu1  ;;  %v1035_v2 = vmul.f32 %v1637_v46, %v1637_v46 }
 0x17c   : > { %v1079_v55 = vadd.f32 %v1078_v45, %v1032_v43  ;;  %v1476_v57 = vpack.c.bf16 %v611_v50, %v608_v38  ;;  %v979_v58 = vadd.f32 %v978_v40, %v611_v50  ;;  %v1033_v59 = vmul.f32 %v611_v50, %v611_v50 }
 0x17d   : > { %1553 = vst [vmem:[%s2208_s20 + $0x58] sm:$0xff] %v1481_v48   ;;  %1565 = vst [vmem:[%s2208_s20 + $0xb8] sm:$0xff] %v1541_v51   ;;  %v1536_v60 = vpack.c.bf16 %v2288_v52, %v2281_v39 }
 0x17e   : > { %1552 = vst [vmem:[%s2208_s20 + $0x50] sm:$0xff] %v1476_v57   ;;  %v980_v63 = vadd.f32 %v1636_v32, %v979_v58  ;;  %v1080_v0 = vadd.f32 %v1079_v55, %v1033_v59 }
 0x17f   : > { %1564 = vst [vmem:[%s2208_s20 + $0xb0] sm:$0xff] %v1536_v60  }
 0x180   : > { %v1081_v3 = vadd.f32 %v1080_v0, %v1034_v62  ;;  %v981_v4 = vadd.f32 %v1637_v46, %v980_v63 }
 0x181   : > { %1867 = shalt.err (!%p1864_p5)
}
 0x182   : > { %s1868_s27 = scalar_lea.hbm %s2293_s7, 3072  ;;  %s1872_s6 = scalar_lea.hbm %s2455_s2, 6144 }
 0x183   : > { %p1869_p9 = scmp.ne.s32.totalorder %s2293_s7, %s1868_s27  ;;  %p1873_p3 = scmp.lt.u32.totalorder %s2293_s7, %s2455_s2 }
 0x184   : > { %p1874_p7 = scmp.lt.u32.totalorder %s1872_s6, %s1868_s27  ;;  %p1876_p4 = scmp.lt.u32.totalorder %s1868_s27, %s2293_s7 }
 0x185   : > { %p1870_p1 = pnand %p1869_p9, %p2097_p10 }
 0x186   : > { %p1875_p11 = por %p1874_p7, %p1873_p3 }
 0x187   : > { %p1871_p2 = pneg %p1870_p1 }
 0x188   : > { %p1877_p6 = por %p1876_p4, %p1875_p11 }
 0x18a   : > { %p1878_p8 = pnand %p1877_p6, %p1871_p2 }
 0x18c   : > { %1881 = shalt.err (!%p1878_p8)
}
 0x18d   : > { %s1979_s22 = smov 64   ;;  %s1980_s10 = smov 4   ;;  %v982_v7 = vadd.f32 %v981_v4, %v2196_v35  ;;  %v1082_v9 = vadd.f32 %v1081_v3, %v1035_v2  ;;  %v1037_v12 = vmul.f32 %v2202_v42, %v2202_v42  ;;  %v1038_v15 = vmul.f32 %v2194_v33, %v2194_v33 }
 0x18e   : > { %1688 = dma.vmem_to_hbm [thread:$0]  (%p2097_p10), %s2299_s24, 3072, %s2293_s7, %s1117_s18, %s1979_s22, %s1979_s22, %s1980_s10   ;;  %v1039_v20 = vmul.f32 %v2198_v37, %v2198_v37  ;;  %v1040_v35 = vmul.f32 %v2216_v56, %v2216_v56  ;;  %v1041_v28 = vmul.f32 %v2222_v1, %v2222_v1  ;;  %v1045_v43 = vmul.f32 %v2238_v25, %v2238_v25 }
 0x18f   : > { %v1083_v10 = vadd.f32 %v1082_v9, %v1036_v5  ;;  %v983_v11 = vadd.f32 %v982_v7, %v2202_v42  ;;  %v1049_v58 = vmul.f32 %v2254_v53, %v2254_v53  ;;  %v1053_v4 = vmul.f32 %v2270_v19, %v2270_v19  ;;  %s1289_s24 = sshll.u32 %s2154_s25, 1  ;;  %s1372_s11 = sshll.u32 %s1964_s15, 5 }
 0x190   : > { %s234_s7 = scalar_lea.vmem [#allocation8], %s1289_s24  ;;  %vm1113_vm0 = vcmask 1040384   ;;  %s2404_s30 = scalar_lea.hbm %s2456_s3, %s1372_s11 }
 0x191   : > { %v984_v17 = vadd.f32 %v2194_v33, %v983_v11  ;;  %v1084_v18 = vadd.f32 %v1083_v10, %v1037_v12  ;;  %v1042_v33 = vmul.f32 %v2214_v54, %v2214_v54  ;;  %s1154_s18 = sshll.u32 %s234_s7, 4  ;;  %s1122_s21 = scalar_lea.sflag [#allocation9], %s2154_s25  ;;  %s2406_s18 = int_to_ptr.vmem [resolvable:$true] %s1154_s18 }
 0x192   : > { %s1882_s27 = scalar_lea.vmem %s2406_s18, 32  ;;  %s1981_s15 = smov [#allocation8]  }
 0x193   : > { %v1085_v22 = vadd.f32 %v1084_v18, %v1038_v15  ;;  %v985_v23 = vadd.f32 %v2198_v37, %v984_v17  ;;  %v1043_v37 = vmul.f32 %v2218_v61, %v2218_v61  ;;  %v1058_v17 = vmul.f32 %v2278_v36, %v2278_v36  ;;  %p1883_p12 = scmp.ne.s32.totalorder %s2406_s18, %s1882_s27  ;;  %s1886_s4 = sshll.u32 %s1981_s15, 4  ;;  %s1887_s4 = int_to_ptr.vmem [resolvable:$false] %s1886_s4 }
 0x194   : > { %s1888_s26 = scalar_lea.vmem %s1887_s4, 64  ;;  %p1889_p5 = scmp.lt.s32.totalorder %s2406_s18, %s1887_s4 }
 0x195   : > { %v986_v24 = vadd.f32 %v985_v23, %v2216_v56  ;;  %v1086_v26 = vadd.f32 %v1085_v22, %v1039_v20  ;;  %v1044_v56 = vmul.f32 %v2232_v16, %v2232_v16  ;;  %p1884_p13 = pnand %p1883_p12, %p2097_p10  ;;  %p1890_p9 = scmp.lt.s32.totalorder %s1888_s26, %s1882_s27 }
 0x197   : > { %v1087_v27 = vadd.f32 %v1086_v26, %v1040_v35  ;;  %v987_v42 = vadd.f32 %v986_v24, %v2222_v1  ;;  %p1885_p0 = pneg %p1884_p13  ;;  %p1891_p1 = por %p1890_p9, %p1889_p5 }
 0x199   : > { %v988_v29 = vadd.f32 %v2214_v54, %v987_v42  ;;  %v1088_v30 = vadd.f32 %v1087_v27, %v1041_v28  ;;  %v1046_v54 = vmul.f32 %v2230_v14, %v2230_v14  ;;  %p1892_p2 = pnand %p1891_p1, %p1885_p0 }
 0x19b   : > { %v1089_v31 = vadd.f32 %v1088_v30, %v1042_v33  ;;  %v989_v32 = vadd.f32 %v2218_v61, %v988_v29  ;;  %v1047_v61 = vmul.f32 %v2234_v21, %v2234_v21 }
 0x19d   : > { %v990_v34 = vadd.f32 %v989_v32, %v2232_v16  ;;  %v1090_v38 = vadd.f32 %v1089_v31, %v1043_v37  ;;  %v1048_v16 = vmul.f32 %v2248_v44, %v2248_v44 }
 0x19f   : > { %v1091_v40 = vadd.f32 %v1090_v38, %v1044_v56  ;;  %v991_v1 = vadd.f32 %v990_v34, %v2238_v25 }
 0x1a1   : > { %v992_v45 = vadd.f32 %v2230_v14, %v991_v1  ;;  %v1092_v46 = vadd.f32 %v1091_v40, %v1045_v43  ;;  %v1050_v14 = vmul.f32 %v2246_v41, %v2246_v41 }
 0x1a3   : > { %v1093_v48 = vadd.f32 %v1092_v46, %v1046_v54  ;;  %v993_v50 = vadd.f32 %v2234_v21, %v992_v45  ;;  %v1051_v21 = vmul.f32 %v2250_v49, %v2250_v49 }
 0x1a5   : > { %v994_v51 = vadd.f32 %v993_v50, %v2248_v44  ;;  %v1094_v55 = vadd.f32 %v1093_v48, %v1047_v61  ;;  %v1052_v44 = vmul.f32 %v2264_v8, %v2264_v8 }
 0x1a7   : > { %v1095_v57 = vadd.f32 %v1094_v55, %v1048_v16  ;;  %v995_v25 = vadd.f32 %v994_v51, %v2254_v53 }
 0x1a9   : > { %v996_v59 = vadd.f32 %v2246_v41, %v995_v25  ;;  %v1096_v60 = vadd.f32 %v1095_v57, %v1049_v58  ;;  %v1054_v41 = vmul.f32 %v2262_v6, %v2262_v6 }
 0x1ab   : > { %v1097_v62 = vadd.f32 %v1096_v60, %v1050_v14  ;;  %v997_v63 = vadd.f32 %v2250_v49, %v996_v59  ;;  %v1055_v49 = vmul.f32 %v2266_v13, %v2266_v13 }
 0x1ad   : > { %v998_v0 = vadd.f32 %v997_v63, %v2264_v8  ;;  %v1098_v2 = vadd.f32 %v1097_v62, %v1051_v21  ;;  %v1056_v8 = vmul.f32 %v2281_v39, %v2281_v39 }
 0x1af   : > { %v1099_v3 = vadd.f32 %v1098_v2, %v1052_v44  ;;  %v999_v53 = vadd.f32 %v998_v0, %v2270_v19 }
 0x1b1   : > { %v1000_v5 = vadd.f32 %v2262_v6, %v999_v53  ;;  %v1100_v7 = vadd.f32 %v1099_v3, %v1053_v4  ;;  %v1057_v6 = vmul.f32 %v2288_v52, %v2288_v52 }
 0x1b3   : > { %v1101_v9 = vadd.f32 %v1100_v7, %v1054_v41  ;;  %v1001_v10 = vadd.f32 %v2266_v13, %v1000_v5  ;;  %v1059_v13 = vmul.f32 %v2283_v47, %v2283_v47 }
 0x1b5   : > { %v1002_v11 = vadd.f32 %v1001_v10, %v2281_v39  ;;  %v1102_v12 = vadd.f32 %v1101_v9, %v1055_v49 }
 0x1b7   : > { %v1103_v19 = vadd.f32 %v1102_v12, %v1056_v8  ;;  %v1003_v15 = vadd.f32 %v1002_v11, %v2288_v52 }
 0x1b9   : > { %v1004_v18 = vadd.f32 %v2278_v36, %v1003_v15  ;;  %v1104_v20 = vadd.f32 %v1103_v19, %v1057_v6 }
 0x1bb   : > { %v1005_v39 = vadd.f32 %v2283_v47, %v1004_v18  ;;  %v1105_v22 = vadd.f32 %v1104_v20, %v1058_v17 }
 0x1bd   : > { %v1006_v23 = vrot.slane %v1005_v39, 4  ;;  %v1106_v35 = vadd.f32 %v1105_v22, %v1059_v13 }
 0x1bf   : > { %v1007_v24 = vadd.f32 %v1006_v23, %v1005_v39  ;;  %v1107_v26 = vrot.slane %v1106_v35, 4 }
 0x1c1   : > { %v1008_v27 = vrot.slane %v1007_v24, 2  ;;  %v1108_v42 = vadd.f32 %v1107_v26, %v1106_v35 }
 0x1c3   : > { %v1009_v52 = vadd.f32 %v1008_v27, %v1007_v24  ;;  %v1109_v28 = vrot.slane %v1108_v42, 2 }
 0x1c5   : > { %v1010_v33 = vrot.slane %v1009_v52, 1  ;;  %v1110_v36 = vadd.f32 %v1109_v28, %v1108_v42 }
 0x1c7   : > { %v1111_v29 = vrot.slane %v1110_v36, 1  ;;  %v1011_v47 = vadd.f32 %v1010_v33, %v1009_v52 }
 0x1c9   : > { %v1112_v30 = vadd.f32 %v1111_v29, %v1110_v36 }
 0x1cb   : > { %v1114_v37 = vsel %vm1113_vm0, %v1011_v47, %v1112_v30 }
 0x1cc   : > { %1115 = vst [vmem:[%s234_s7] sm:$0x3] %v1114_v37 }
 0x1cd   : > { %1895 = shalt.err (!%p1892_p2)
}
 0x1ce   : > { %s1896_s25 = scalar_lea.hbm %s2404_s30, 32  ;;  %s1900_s20 = scalar_lea.hbm %s2456_s3, 64 }
 0x1cf   : > { %p1897_p3 = scmp.ne.s32.totalorder %s2404_s30, %s1896_s25  ;;  %p1901_p4 = scmp.lt.u32.totalorder %s2404_s30, %s2456_s3 }
 0x1d0   : > { %p1902_p6 = scmp.lt.u32.totalorder %s1900_s20, %s1896_s25  ;;  %p1904_p12 = scmp.lt.u32.totalorder %s1896_s25, %s2404_s30 }
 0x1d1   : > { %p1898_p7 = pnand %p1897_p3, %p2097_p10 }
 0x1d2   : > { %p1903_p8 = por %p1902_p6, %p1901_p4 }
 0x1d3   : > { %p1899_p11 = pneg %p1898_p7 }
 0x1d4   : > { %p1905_p13 = por %p1904_p12, %p1903_p8 }
 0x1d6   : > { %p1906_p0 = pnand %p1905_p13, %p1899_p11 }
 0x1d8   : > { %1909 = shalt.err (!%p1906_p0)
}
 0x1d9   : > { %1689 = dma.vmem_to_hbm [thread:$0]  (%p2097_p10), %s2406_s18, 32, %s2404_s30, %s1122_s21  }
 0x1da PF: > { %s1166_s24 = sand.u32 1, %s1952_s12   ;;  %p2473_p5 = scmp.ne.s32.totalorder %s2464_s23, 0 }
 0x1db   : > { %p2474_p9 = scmp.ge.s32.totalorder %s1972_s17, 2  ;;  %s1167_s11 = scalar_lea.sflag [#allocation4], %s1166_s24 }
 0x1dd   : > { %p1701_p1 = pnand %p2474_p9, %p2473_p5 }
 0x1df   : > { %1943 = dma.done.wait (!%p1701_p1), %s1167_s11, 3072  }
 0x1e0   : > { %1945 = vsyncadd (!%p1701_p1), %s1167_s11, 4294964224  ;;  %s1176_s7 = scalar_lea.sflag [#allocation9], %s1166_s24 }
 0x1e1   : > { %1947 = dma.done.wait (!%p1701_p1), %s1176_s7, 32  }
 0x1e2   : > { %1949 = vsyncadd (!%p1701_p1), %s1176_s7, 4294967264  ;;  %s24_s17 = sadd.s32 1, %s1972_s17   ;;  %s2475_s12 = smov %s1956_s13 }
 0x1e3   : > { %p21_p2 = scmp.ge.s32.totalorder %s24_s17, 4   ;;  %s2476_s13 = smov %s1960_s14 }
 0x1e4   : > { %s2477_s14 = smov %s2106_s5  ;;  %s2478_s15 = smov %s1968_s16 }
 0x1e5   : > { %s2479_s16 = smov %s2481_s28  ;;  %23 = sbr.rel (!%p21_p2) target bundleno = 9 (0x9), region = 94 }
 0x1ec   :  { %1181 = vsyncpa [#allocation3], 1 }
 0x1ed   :  { %1183 = vsyncpa [#allocation3 + $0x1], 1 }
 0x1ee   :  { %1184 = vsyncpa [#allocation6], 1 }
 0x1ef   :  { %1185 = vsyncpa [#allocation4], 1 }
 0x1f0   :  { %1187 = vsyncpa [#allocation4 + $0x1], 1 }
 0x1f1   :  { %1188 = vsyncpa [#allocation9], 1 }
 0x1f2   :  { %1190 = vsyncpa [#allocation9 + $0x1], 1 }

</bundles_post_ra>
